<compile_context>
chip_gen: v6e
topology: v6e:2x2x1
jax: 0.10.0
libtpu: 0.0.40
codegen_flags: <defaults>
</compile_context>

<pallas_src>
import jax
import jax.numpy as jnp
from jax.experimental import pallas as pl
from jax.experimental.pallas import tpu as pltpu

_SUBLANE = 8


def _round_up(x, m):
    return (x + m - 1) // m * m


def _cdiv(a, b):
    return -(-a // b)


def _qfunction_kernel(z_ref, w1_ref, b1_ref, w2_ref, b2_ref, w3_ref, b3_ref,
                      out_ref):
    """3-layer MLP on one [tb, in_dim] batch tile.

    trunk: Linear -> ReLU -> Linear -> ReLU -> Linear(hidden, 1)
    Matmuls run in the weights' dtype (f32 or bf16) with f32 accumulation;
    bias/ReLU/final reduction are f32 on the VPU/XLU.
    """
    cdt = w1_ref.dtype

    z = z_ref[...].astype(cdt)                                   # [tb, in_dim]

    # Layer 1: [tb, in_dim] @ [in_dim, hidden] + [1, hidden], ReLU.
    h1 = jnp.dot(z, w1_ref[...], preferred_element_type=jnp.float32)
    h1 = jnp.maximum(h1 + b1_ref[...], 0.0)                      # f32

    # Layer 2: [tb, hidden] @ [hidden, hidden] + [1, hidden], ReLU.
    h2 = jnp.dot(h1.astype(cdt), w2_ref[...],
                 preferred_element_type=jnp.float32)
    h2 = jnp.maximum(h2 + b2_ref[...], 0.0)                      # f32

    # Layer 3 as a VPU multiply + cross-lane reduction (output width is 1,
    # so a padded MXU pass and 128-lane writeback would be pure waste).
    w3 = w3_ref[...].astype(jnp.float32)                         # [1, hidden]
    q = jnp.sum(h2 * w3, axis=-1, keepdims=True)                 # [tb, 1]
    out_ref[...] = (q + b3_ref[...]).astype(out_ref.dtype)


def prepare_params(params, compute_dtype=jnp.bfloat16):
    """One-time prep: transpose w3 to [1, hidden]; cast weights to the MXU
    compute dtype (bf16 by default); biases stay f32 (added to f32 acc)."""
    return {
        "w1": params["w1"].astype(compute_dtype),          # [in_dim, hidden]
        "b1": params["b1"].astype(jnp.float32),            # [1, hidden]
        "w2": params["w2"].astype(compute_dtype),          # [hidden, hidden]
        "b2": params["b2"].astype(jnp.float32),            # [1, hidden]
        "w3": params["w3"].T.astype(compute_dtype),        # [1, hidden]
        "b3": params["b3"].astype(jnp.float32),            # [1, 1]
    }


def qfunction_forward(z, pparams, *, batch_tile=1024, min_tiles=1):
    """Runs the QFunction trunk. z: [B, in_dim]; pparams: prepare_params(...).

    Returns [B, 1] float32 (matches nn.Linear(hidden_dim, 1)).
    min_tiles=2 is recommended on v7x so the parallel batch axis can shard
    across both TensorCores; 1 (a single large tile) is best on v5e/v6e.
    """
    B, in_dim = z.shape
    w1, b1 = pparams["w1"], pparams["b1"]
    w2, b2 = pparams["w2"], pparams["b2"]
    w3, b3 = pparams["w3"], pparams["b3"]
    assert w1.shape[0] == in_dim

    # Batch tiling: pad B only to a sublane multiple, then pick a tile size
    # ~ b8 / n_tiles so large target tiles never over-pad small batches.
    b8 = _round_up(B, _SUBLANE)
    tb_target = max(_SUBLANE, _round_up(batch_tile, _SUBLANE))
    n_tiles = max(min_tiles, _cdiv(b8, tb_target))
    n_tiles = max(1, min(n_tiles, b8 // _SUBLANE))
    tb = _round_up(_cdiv(b8, n_tiles), _SUBLANE)
    n_tiles = _cdiv(b8, tb)
    b_pad = tb * n_tiles

    z_p = z if b_pad == B else jnp.pad(z, ((0, b_pad - B), (0, 0)))

    resident = lambda a: pl.BlockSpec(a.shape, lambda i: (0, 0))

    # Scoped-VMEM estimate: double-buffered activation tiles + (conservatively
    # double-buffered) resident weights.  Only raise the limit when it would
    # exceed v5e's 16 MiB default (keeps the default path untouched elsewhere).
    weight_bytes = sum(int(a.size) * a.dtype.itemsize
                       for a in (w1, b1, w2, b2, w3, b3))
    act_bytes = tb * in_dim * z_p.dtype.itemsize + tb * 4
    vmem_est = 2 * act_bytes + 2 * weight_bytes
    cp_kwargs = {"dimension_semantics": ("parallel",)}
    if vmem_est > 14 * 1024 * 1024:
        cp_kwargs["vmem_limit_bytes"] = int(vmem_est + vmem_est // 4)

    out = pl.pallas_call(
        _qfunction_kernel,
        out_shape=jax.ShapeDtypeStruct((b_pad, 1), jnp.float32),
        grid=(n_tiles,),
        in_specs=[
            pl.BlockSpec((tb, in_dim), lambda i: (i, 0)),  # z tile (pipelined)
            resident(w1), resident(b1),                    # weights stay resident
            resident(w2), resident(b2),
            resident(w3), resident(b3),
        ],
        out_specs=pl.BlockSpec((tb, 1), lambda i: (i, 0)),
        compiler_params=pltpu.CompilerParams(**cp_kwargs),
    )(z_p, w1, b1, w2, b2, w3, b3)

    return out[:B]


def init_qfunction_params(key, in_dim, hidden_dim):
    """nn.Linear-style init (uniform +-1/sqrt(fan_in)); weights stored [in, out]."""
    k1, k2, k3, k4, k5, k6 = jax.random.split(key, 6)

    def lin(kw, kb, fan_in, fan_out):
        bound = 1.0 / jnp.sqrt(jnp.float32(fan_in))
        w = jax.random.uniform(kw, (fan_in, fan_out), jnp.float32,
                               minval=-bound, maxval=bound)
        b = jax.random.uniform(kb, (1, fan_out), jnp.float32,
                               minval=-bound, maxval=bound)
        return w, b

    w1, b1 = lin(k1, k2, in_dim, hidden_dim)
    w2, b2 = lin(k3, k4, hidden_dim, hidden_dim)
    w3, b3 = lin(k5, k6, hidden_dim, 1)
    return {"w1": w1, "b1": b1, "w2": w2, "b2": b2, "w3": w3, "b3": b3}


def qfunction_ref(z, params):
    """Pure-JAX reference for correctness checking."""
    h = jnp.maximum(z @ params["w1"] + params["b1"], 0.0)
    h = jnp.maximum(h @ params["w2"] + params["b2"], 0.0)
    return h @ params["w3"] + params["b3"]


if __name__ == "__main__":
    # Small shapes: batch=8, in_dim=40 (e.g. obs 32 + action 8), hidden=64.
    B, IN_DIM, HIDDEN = 8, 40, 64

    key = jax.random.PRNGKey(0)
    kz, kp = jax.random.split(key)

    z = jax.random.normal(kz, (B, IN_DIM), jnp.float32)
    params = init_qfunction_params(kp, IN_DIM, HIDDEN)
    ref = qfunction_ref(z, params)

    # f32-weight path: matches the pure-JAX reference tightly.
    pp_f32 = prepare_params(params, compute_dtype=jnp.float32)
    out_f32 = jax.block_until_ready(qfunction_forward(z, pp_f32))
    assert out_f32.shape == (B, 1), out_f32.shape
    assert jnp.allclose(out_f32, ref, atol=1e-5, rtol=1e-5), (
        float(jnp.max(jnp.abs(out_f32 - ref))))

    # bf16-weight path (per perf review; f32 accumulation) — relaxed tolerance.
    pp_bf16 = prepare_params(params, compute_dtype=jnp.bfloat16)
    out_bf16 = jax.block_until_ready(qfunction_forward(z, pp_bf16))
    assert out_bf16.shape == (B, 1), out_bf16.shape
    assert jnp.allclose(out_bf16, ref, atol=3e-2, rtol=3e-2), (
        float(jnp.max(jnp.abs(out_bf16 - ref))))

    print("KERNEL_OK")
</pallas_src>

<mosaic_0001>
module attributes {stable_mosaic.version = 11 : i64} {
  func.func @_qfunction_kernel(%arg0: i32, %arg1: memref<8x40xf32, #tpu.memory_space<vmem>>, %arg2: memref<40x64xf32, #tpu.memory_space<vmem>>, %arg3: memref<1x64xf32, #tpu.memory_space<vmem>>, %arg4: memref<64x64xf32, #tpu.memory_space<vmem>>, %arg5: memref<1x64xf32, #tpu.memory_space<vmem>>, %arg6: memref<1x64xf32, #tpu.memory_space<vmem>>, %arg7: memref<1x1xf32, #tpu.memory_space<vmem>>, %arg8: memref<8x1xf32, #tpu.memory_space<vmem>>) attributes {dimension_semantics = [#tpu.dimension_semantics<parallel>], iteration_bounds = array<i64: 1>, scalar_prefetch = 0 : i64, scratch_operands = 0 : i64, tpu.core_type = #tpu.core_type<tc>, window_params = [{transform_indices = @transform_0, window_bounds = array<i64: 8, 40>}, {pipeline_mode = #tpu.pipeline_mode<synchronous>, transform_indices = @transform_1, window_bounds = array<i64: 40, 64>}, {pipeline_mode = #tpu.pipeline_mode<synchronous>, transform_indices = @transform_2, window_bounds = array<i64: 1, 64>}, {pipeline_mode = #tpu.pipeline_mode<synchronous>, transform_indices = @transform_3, window_bounds = array<i64: 64, 64>}, {pipeline_mode = #tpu.pipeline_mode<synchronous>, transform_indices = @transform_4, window_bounds = array<i64: 1, 64>}, {pipeline_mode = #tpu.pipeline_mode<synchronous>, transform_indices = @transform_5, window_bounds = array<i64: 1, 64>}, {pipeline_mode = #tpu.pipeline_mode<synchronous>, transform_indices = @transform_6, window_bounds = array<i64: 1, 1>}, {transform_indices = @transform_7, window_bounds = array<i64: 8, 1>}]} {
    %c0 = arith.constant 0 : index
    %c0_0 = arith.constant 0 : index
    %0 = vector.load %arg1[%c0, %c0_0] : memref<8x40xf32, #tpu.memory_space<vmem>>, vector<8x40xf32>
    %c0_1 = arith.constant 0 : index
    %c0_2 = arith.constant 0 : index
    %1 = vector.load %arg2[%c0_1, %c0_2] : memref<40x64xf32, #tpu.memory_space<vmem>>, vector<40x64xf32>
    %cst = arith.constant dense<0.000000e+00> : vector<8x64xf32>
    %2 = tpu.matmul %0, %1, %cst {dimension_numbers = #tpu.dot_dimension_numbers<[1], [0], [0], [1], [0, 0, 1, 1], [], []>} : vector<8x40xf32>, vector<40x64xf32>, vector<8x64xf32> -> vector<8x64xf32>
    %c0_3 = arith.constant 0 : index
    %c0_4 = arith.constant 0 : index
    %3 = vector.load %arg3[%c0_3, %c0_4] : memref<1x64xf32, #tpu.memory_space<vmem>>, vector<1x64xf32>
    %4 = vector.broadcast %3 : vector<1x64xf32> to vector<8x64xf32>
    %5 = arith.addf %2, %4 : vector<8x64xf32>
    %cst_5 = arith.constant 0.000000e+00 : f32
    %6 = vector.broadcast %cst_5 : f32 to vector<8x64xf32>
    %7 = arith.maximumf %5, %6 : vector<8x64xf32>
    %c0_6 = arith.constant 0 : index
    %c0_7 = arith.constant 0 : index
    %8 = vector.load %arg4[%c0_6, %c0_7] : memref<64x64xf32, #tpu.memory_space<vmem>>, vector<64x64xf32>
    %cst_8 = arith.constant dense<0.000000e+00> : vector<8x64xf32>
    %9 = tpu.matmul %7, %8, %cst_8 {dimension_numbers = #tpu.dot_dimension_numbers<[1], [0], [0], [1], [0, 0, 1, 1], [], []>} : vector<8x64xf32>, vector<64x64xf32>, vector<8x64xf32> -> vector<8x64xf32>
    %c0_9 = arith.constant 0 : index
    %c0_10 = arith.constant 0 : index
    %10 = vector.load %arg5[%c0_9, %c0_10] : memref<1x64xf32, #tpu.memory_space<vmem>>, vector<1x64xf32>
    %11 = vector.broadcast %10 : vector<1x64xf32> to vector<8x64xf32>
    %12 = arith.addf %9, %11 : vector<8x64xf32>
    %cst_11 = arith.constant 0.000000e+00 : f32
    %13 = vector.broadcast %cst_11 : f32 to vector<8x64xf32>
    %14 = arith.maximumf %12, %13 : vector<8x64xf32>
    %c0_12 = arith.constant 0 : index
    %c0_13 = arith.constant 0 : index
    %15 = vector.load %arg6[%c0_12, %c0_13] : memref<1x64xf32, #tpu.memory_space<vmem>>, vector<1x64xf32>
    %16 = vector.broadcast %15 : vector<1x64xf32> to vector<8x64xf32>
    %17 = arith.mulf %14, %16 : vector<8x64xf32>
    %cst_14 = arith.constant dense<0.000000e+00> : vector<8xf32>
    %18 = vector.multi_reduction <add>, %17, %cst_14 [1] : vector<8x64xf32> to vector<8xf32>
    %19 = vector.shape_cast %18 : vector<8xf32> to vector<8x1xf32>
    %c0_15 = arith.constant 0 : index
    %c0_16 = arith.constant 0 : index
    %20 = vector.load %arg7[%c0_15, %c0_16] : memref<1x1xf32, #tpu.memory_space<vmem>>, vector<1x1xf32>
    %21 = vector.broadcast %20 : vector<1x1xf32> to vector<8x1xf32>
    %22 = arith.addf %19, %21 : vector<8x1xf32>
    %c0_17 = arith.constant 0 : index
    %c0_18 = arith.constant 0 : index
    %23 = vector.load %arg8[%c0_17, %c0_18] : memref<8x1xf32, #tpu.memory_space<vmem>>, vector<8x1xf32>
    tpu.vector_store %arg8[%c0_17, %c0_18], %22 {strides = array<i32>} : memref<8x1xf32, #tpu.memory_space<vmem>>, vector<8x1xf32>,
    return
  }
  func.func @transform_0(%arg0: i32) -> (i32, i32) {
    %c0_i32 = arith.constant 0 : i32
    %c0_i32_0 = arith.constant 0 : i32
    return %arg0, %c0_i32 : i32, i32
  }
  func.func @transform_1(%arg0: i32) -> (i32, i32) {
    %c0_i32 = arith.constant 0 : i32
    %c0_i32_0 = arith.constant 0 : i32
    %c0_i32_1 = arith.constant 0 : i32
    return %c0_i32, %c0_i32_0 : i32, i32
  }
  func.func @transform_2(%arg0: i32) -> (i32, i32) {
    %c0_i32 = arith.constant 0 : i32
    %c0_i32_0 = arith.constant 0 : i32
    %c0_i32_1 = arith.constant 0 : i32
    return %c0_i32, %c0_i32_0 : i32, i32
  }
  func.func @transform_3(%arg0: i32) -> (i32, i32) {
    %c0_i32 = arith.constant 0 : i32
    %c0_i32_0 = arith.constant 0 : i32
    %c0_i32_1 = arith.constant 0 : i32
    return %c0_i32, %c0_i32_0 : i32, i32
  }
  func.func @transform_4(%arg0: i32) -> (i32, i32) {
    %c0_i32 = arith.constant 0 : i32
    %c0_i32_0 = arith.constant 0 : i32
    %c0_i32_1 = arith.constant 0 : i32
    return %c0_i32, %c0_i32_0 : i32, i32
  }
  func.func @transform_5(%arg0: i32) -> (i32, i32) {
    %c0_i32 = arith.constant 0 : i32
    %c0_i32_0 = arith.constant 0 : i32
    %c0_i32_1 = arith.constant 0 : i32
    return %c0_i32, %c0_i32_0 : i32, i32
  }
  func.func @transform_6(%arg0: i32) -> (i32, i32) {
    %c0_i32 = arith.constant 0 : i32
    %c0_i32_0 = arith.constant 0 : i32
    %c0_i32_1 = arith.constant 0 : i32
    return %c0_i32, %c0_i32_0 : i32, i32
  }
  func.func @transform_7(%arg0: i32) -> (i32, i32) {
    %c0_i32 = arith.constant 0 : i32
    %c0_i32_0 = arith.constant 0 : i32
    return %arg0, %c0_i32 : i32, i32
  }
}

</mosaic_0001>

<bundles_post_ra>
// kernel: tpu_custom_call.1
= control target key start
LH: loop header
LB: loop body
LE: loop exit
PB: predicated region body
PF: predicated region fallthrough
CT: control target
= control target key end

     0   :  { %s467_s0 = inlined_call_operand.hbm [shape: f32[8,40], index: 0, kind: input, shape index: {}]   ;;  %s468_s1 = inlined_call_operand.hbm [shape: f32[40,64], index: 1, kind: input, shape index: {}]   ;;  %s469_s2 = inlined_call_operand.vmem [shape: f32[1,64], index: 2, kind: input, shape index: {}]   ;;  %s470_s3 = inlined_call_operand.hbm [shape: f32[64,64], index: 3, kind: input, shape index: {}]   ;;  %s471_s4 = inlined_call_operand.vmem [shape: f32[1,64], index: 4, kind: input, shape index: {}]   ;;  %s472_s5 = inlined_call_operand.vmem [shape: f32[1,64], index: 5, kind: input, shape index: {}]   ;;  %s473_s6 = inlined_call_operand.<no memory space> [shape: f32[1,1], index: 6, kind: input, shape index: {}]   ;;  %s474_s7 = inlined_call_operand.vmem [shape: f32[8,1], index: 7, kind: output, shape index: {}]  }
   0x1   :  { %v12_v0 = vstv %s473_s6 }
   0x2   :  { %13 = vst [vmem:[#allocation2] sm:$0x1] %v12_v0 }
   0x3   :  { %14 = vsyncpa [#allocation4], 0 }
   0x4   :  { %15 = vsyncpa [#allocation6], 0  ;;  %s396_s26 = smov [#allocation5]  }
   0x5   :  { %s31_s27 = sshll.u32 %s396_s26, 4  ;;  %s32_s27 = int_to_ptr.vmem [resolvable:$true] %s31_s27 }
   0x6   :  { %s340_s28 = scalar_lea.vmem %s32_s27, 640  ;;  %p345_p1 = scmp.lt.s32.totalorder %s32_s27, %s32_s27 }
   0x7   :  { %p341_p0 = scmp.ne.s32.totalorder %s32_s27, %s340_s28  ;;  %p346_p2 = scmp.lt.s32.totalorder %s340_s28, %s340_s28 }
   0x9   :  { %p347_p3 = por %p346_p2, %p345_p1 }
   0xb   :  { %p348_p4 = pnand %p347_p3, %p341_p0 }
   0xd   :  { %351 = shalt.err (!%p348_p4)
}
   0xe   :  { %s397_s29 = smov 128   ;;  %s398_s30 = smov 8  }
   0xf   :  { %37 = dma.hbm_to_vmem [thread:$0]  %s468_s1, 640, %s32_s27, [#allocation6], %s397_s29, %s397_s29, %s398_s30  }
  0x10   :  { %s399_s6 = smov [#allocation3]   ;;  %s400_s11 = smov [#allocation7]  }
  0x11   :  { %s22_s10 = sshll.u32 %s399_s6, 4  ;;  %s45_s12 = sshll.u32 %s400_s11, 4  ;;  %s23_s10 = int_to_ptr.vmem [resolvable:$true] %s22_s10  ;;  %s46_s12 = int_to_ptr.vmem [resolvable:$true] %s45_s12 }
  0x12   :  { %s360_s13 = scalar_lea.vmem %s23_s10, 128  ;;  %p365_p6 = scmp.lt.s32.totalorder %s23_s10, %s23_s10 }
  0x13   :  { %p361_p5 = scmp.ne.s32.totalorder %s23_s10, %s360_s13  ;;  %p366_p7 = scmp.lt.s32.totalorder %s360_s13, %s360_s13 }
  0x15   :  { %p367_p8 = por %p366_p7, %p365_p6 }
  0x17   :  { %p368_p9 = pnand %p367_p8, %p361_p5 }
  0x19   :  { %371 = shalt.err (!%p368_p9)
}
  0x1a   :  { %25 = dma.hbm_to_vmem [thread:$0]  %s467_s0, 128, %s23_s10, [#allocation4]  }
  0x1b   :  { %s380_s16 = scalar_lea.vmem %s46_s12, 1024  ;;  %p385_p11 = scmp.lt.s32.totalorder %s46_s12, %s46_s12 }
  0x1c   :  { %p381_p10 = scmp.ne.s32.totalorder %s46_s12, %s380_s16  ;;  %p386_p12 = scmp.lt.s32.totalorder %s380_s16, %s380_s16 }
  0x1e   :  { %p387_p13 = por %p386_p12, %p385_p11 }
  0x20   :  { %p388_p0 = pnand %p387_p13, %p381_p10 }
  0x22   :  { %391 = shalt.err (!%p388_p0)
}
  0x23   :  { %51 = dma.hbm_to_vmem [thread:$0]  %s470_s3, 1024, %s46_s12, [#allocation6], %s397_s29, %s397_s29, %s398_s30  }
  0x24   :  { %392 = dma.done.wait [#allocation4], 128  }
  0x25   :  { %393 = vsyncadd [#allocation4], 4294967168 }
  0x26   :  { %394 = dma.done.wait [#allocation6], 1664  }
  0x27   :  { %395 = vsyncadd [#allocation6], 4294965632  ;;  %v401_v1 = vmov 0.0   ;;  %vm402_vm0 = vmmov 0   ;;  %v72_v2 = vld [vmem:[#allocation5 + $0x20] sm:$0xff]  ;;  %v71_v3 = vld [vmem:[#allocation5 + $0x18] sm:$0xff] }
  0x28   :  { %293 = vmatprep.subr.mxu0 %v401_v1  ;;  %303 = vmatprep.mubr.msk.f32.mxu0 %vm402_vm0, %v401_v1  ;;  %v70_v4 = vld [vmem:[#allocation5 + $0x10] sm:$0xff]  ;;  %v162_v5 = vld [vmem:[#allocation7 + $0x38] sm:$0xff]  ;;  %v161_v6 = vld [vmem:[#allocation7 + $0x30] sm:$0xff]  ;;  %vm80_vm1 = vcmask 326656   ;;  %vm170_vm2 = vcmask 523264   ;;  %vm264_vm3 = vcmask 7168  }
  0x29   :  { %306 = vmatprep.subr.mxu1 %v401_v1  ;;  %322 = vmatprep.mubr.msk.f32.mxu1 %vm402_vm0, %v401_v1  ;;  %v69_v7 = vld [vmem:[#allocation5 + $0x8] sm:$0xff]  ;;  %v160_v8 = vld [vmem:[#allocation7 + $0x28] sm:$0xff]  ;;  %v68_v9 = vld [vmem:[#allocation5] sm:$0xff] }
  0x2a   :  { %294 = vmatpush3.msra.mxu0 %v72_v2  ;;  %307 = vmatpush3.msra.mxu1 %v162_v5  ;;  %v159_v10 = vld [vmem:[#allocation7 + $0x20] sm:$0xff]  ;;  %v67_v11 = vld [vmem:[#allocation3] sm:$0xff]  ;;  %v158_v12 = vld [vmem:[#allocation7 + $0x18] sm:$0xff] }
  0x2b   :  { %295 = vmatprep.subr.mxu0 %v401_v1  ;;  %308 = vmatprep.subr.mxu1 %v401_v1  ;;  %v157_v13 = vld [vmem:[#allocation7 + $0x10] sm:$0xff]  ;;  %v156_v14 = vld [vmem:[#allocation7 + $0x8] sm:$0xff]  ;;  %v155_v15 = vld [vmem:[#allocation7] sm:$0xff] }
  0x2c   :  { %296 = vmatpush3.msra.mxu0 %v71_v3  ;;  %309 = vmatpush3.msra.mxu1 %v161_v6  ;;  %v272_v16 = vld [vmem:[%s469_s2] ss:$0 sm:$0xff] }
  0x2d   :  { %297 = vmatprep.subr.mxu0 %v401_v1  ;;  %310 = vmatprep.subr.mxu1 %v401_v1  ;;  %v274_v21 = vld [vmem:[%s471_s4] ss:$0 sm:$0xff] }
  0x2e   :  { %298 = vmatpush3.msra.mxu0 %v70_v4  ;;  %311 = vmatpush3.msra.mxu1 %v160_v8  ;;  %v276_v25 = vld [vmem:[%s472_s5] ss:$0 sm:$0xff] }
  0x2f   :  { %299 = vmatprep.subr.mxu0 %v401_v1  ;;  %312 = vmatprep.subr.mxu1 %v401_v1  ;;  %v277_v29 = vld [vmem:[#allocation2] ss:$0 sm:$0xff] }
  0x30   :  { %300 = vmatpush3.msra.mxu0 %v69_v7  ;;  %313 = vmatpush3.msra.mxu1 %v159_v10 }
  0x31   :  { %301 = vmatprep.subr.mxu0 %v401_v1  ;;  %314 = vmatprep.subr.mxu1 %v401_v1 }
  0x32   :  { %302 = vmatpush3.msra.mxu0 %v68_v9  ;;  %315 = vmatpush3.msra.mxu1 %v158_v12 }
  0x33   :  { %304 = vmatmul.mubr.msk.f32.vlgmr.msra.gmra.mxu0 %vm80_vm1, %v67_v11  ;;  %316 = vmatprep.subr.mxu1 %v401_v1 }
  0x34   :  { %317 = vmatpush3.msra.mxu1 %v157_v13 }
  0x35   :  { %318 = vmatprep.subr.mxu1 %v401_v1 }
  0x36   :  { %319 = vmatpush3.msra.mxu1 %v156_v14 }
  0x37   :  { %320 = vmatprep.subr.mxu1 %v401_v1 }
  0x38   :  { %321 = vmatpush3.msra.mxu1 %v155_v15 }
  0xf3   :  { %v150_v17 = vpop.f32.mrf.mxu0 }
  0xf4   :  { %v151_v18 = vadd.f32 %v272_v16, %v150_v17 }
  0xf5   :  { %v305_v19 = vpop.f32.mrf.mxu0 }
  0xf6   :  { %v154_v20 = vmax.f32 %v151_v18, 0.0 }
  0xf8   :  { %323 = vmatmul.mubr.msk.f32.vlgmr.msra.gmra.mxu1 %vm170_vm2, %v154_v20 }
 0x1b8   :  { %v240_v22 = vpop.f32.mrf.mxu1 }
 0x1b9   :  { %v241_v23 = vadd.f32 %v274_v21, %v240_v22 }
 0x1ba   :  { %v324_v24 = vpop.f32.mrf.mxu1 }
 0x1bb   :  { %v244_v26 = vmax.f32 %v241_v23, 0.0 }
 0x1bd   :  { %v252_v27 = vmul.f32 %v276_v25, %v244_v26 }
 0x1bf   :  { %v253_v28 = vsel %vm170_vm2, %v252_v27, 0.0 }
 0x1c0   :  { %254 = vadd.xlane.f32.xlu0 %v253_v28 }
 0x249   :  { %v255_v30 = vpop.xlane.xlu0 %254 }
 0x24a   :  { %v263_v31 = vadd.f32 %v277_v29, %v255_v30 }
 0x24c   :  { %265 = vst.msk [vmem:[%s474_s7] sm:$0xff] %vm264_vm3, %v263_v31 }
 0x24d   :  { %270 = vsyncpa [#allocation4], 1 }
 0x24e   :  { %271 = vsyncpa [#allocation6], 1 }

</bundles_post_ra>
